<compile_context>
chip_gen: v7x
topology: tpu7x:2x2x1
jax: 0.10.0
libtpu: 0.0.40
codegen_flags: <defaults>
</compile_context>

<pallas_src>
import numpy as np
import jax
import jax.numpy as jnp
from jax.experimental import pallas as pl
from jax.experimental.pallas import tpu as pltpu


# ---------------------------------------------------------------------------
# Gaussian taps (matches torchvision.transforms.functional._get_gaussian_kernel1d)
# ---------------------------------------------------------------------------
def _gaussian_kernel1d_jnp(kernel_size: int, sigma):
    half = (kernel_size - 1) * 0.5
    x = jnp.linspace(-half, half, kernel_size, dtype=jnp.float32)
    s = jnp.asarray(sigma, dtype=jnp.float32)
    pdf = jnp.exp(-0.5 * jnp.square(x / s))
    return pdf / jnp.sum(pdf)


def _gaussian_kernel1d_np(kernel_size: int, sigma: float) -> np.ndarray:
    half = (kernel_size - 1) * 0.5
    x = np.linspace(-half, half, kernel_size, dtype=np.float32)
    pdf = np.exp(-0.5 * (x / np.float32(sigma)) ** 2)
    return (pdf / pdf.sum()).astype(np.float32)


# ---------------------------------------------------------------------------
# Pallas kernel: separable Gaussian blur with fused reflect padding.
# Processes a (G, H, W) slab of independent image planes per grid step.
# ---------------------------------------------------------------------------
def _make_blur_kernel(H: int, W: int, K: int):
    pad = K // 2
    Hp = H + 2 * pad

    def blur_kernel(w_ref, x_ref, o_ref, xp_ref, acc_ref):
        # w_ref   : (K,)           f32 SMEM   - Gaussian taps (runtime, no retrace per sigma)
        # x_ref   : (G, H, W)      input tile (VMEM, double-buffered by Pallas)
        # o_ref   : (G, H, W)      output tile
        # xp_ref  : (G, Hp, Wp)    f32 VMEM scratch - reflect-padded planes
        # acc_ref : (G, Hp, W)     f32 VMEM scratch - horizontally blurred rows
        xf = x_ref[...].astype(jnp.float32)  # f32 accumulation (bf16-safe, v5e-safe)

        # ---- build the reflect-padded slab in VMEM (padding fused, no extra HBM pass) ----
        xp_ref[:, pad:pad + H, pad:pad + W] = xf
        for p in range(pad):  # left / right halo columns (reflect, no edge repeat)
            xp_ref[:, pad:pad + H, p:p + 1] = (
                x_ref[:, :, pad - p:pad - p + 1].astype(jnp.float32))
            xp_ref[:, pad:pad + H, pad + W + p:pad + W + p + 1] = (
                x_ref[:, :, W - 2 - p:W - 1 - p].astype(jnp.float32))
        for p in range(pad):  # top / bottom halo rows (copied after columns -> corners OK)
            xp_ref[:, p:p + 1, :] = xp_ref[:, 2 * pad - p:2 * pad - p + 1, :]
            xp_ref[:, pad + H + p:pad + H + p + 1, :] = (
                xp_ref[:, pad + H - 2 - p:pad + H - 1 - p, :])

        # ---- horizontal pass: K shifted windows as offset LOADS from the ref ----
        acc = w_ref[0] * xp_ref[:, :, 0:W]
        for t in range(1, K):
            acc = acc + w_ref[t] * xp_ref[:, :, t:t + W]
        acc_ref[...] = acc  # full, offset-0 store

        # ---- vertical pass: sublane-offset loads from the scratch ref ----
        out = w_ref[0] * acc_ref[:, 0:H, :]
        for t in range(1, K):
            out = out + w_ref[t] * acc_ref[:, t:t + H, :]
        o_ref[...] = out.astype(o_ref.dtype)

    return blur_kernel


def _padded_plane_bytes(rows: int, cols: int, itemsize: int) -> int:
    # VMEM layout pads the last dim to 128 lanes and the 2nd-to-last to 8 sublanes.
    r = -(-rows // 8) * 8
    c = -(-cols // 128) * 128
    return r * c * itemsize


def gaussian_blur_pallas(x, kernel_size: int, weights):
    """Separable Gaussian blur (reflect padding) over an NCHW tensor."""
    N, C, H, W = x.shape
    K = int(kernel_size)
    if K % 2 != 1:
        raise ValueError("kernel_size must be odd (torchvision GaussianBlur requirement)")
    pad = K // 2
    if H < pad + 1 or W < pad + 1:
        raise ValueError("reflect padding requires H, W > kernel_size // 2")
    Hp, Wp = H + 2 * pad, W + 2 * pad

    P = N * C
    x_flat = x.reshape(P, H, W)

    # ---- pick planes-per-step G against a VMEM budget valid on v5e / v6e / v7x ----
    itemsize = jnp.dtype(x.dtype).itemsize
    per_plane = (
        2 * _padded_plane_bytes(H, W, itemsize)    # double-buffered input tile
        + 2 * _padded_plane_bytes(H, W, itemsize)  # double-buffered output tile
        + _padded_plane_bytes(Hp, Wp, 4)           # xp scratch (f32)
        + _padded_plane_bytes(Hp, W, 4)            # acc scratch (f32)
    )
    budget = 8 * 1024 * 1024                       # conservative; fits v7x's 64 MiB VMEM
    g_budget = max(1, budget // per_plane)
    g_target = min(g_budget, max(1, P // 2))       # keep grid >= 2 for v7x's 2 TensorCores
    G = 1
    for d in range(1, P + 1):                      # largest divisor of P that fits the cap
        if P % d == 0 and d <= g_target:
            G = d
    grid = (P // G,)

    w_arr = jnp.asarray(weights, dtype=jnp.float32)  # (K,) taps, live in SMEM

    out_flat = pl.pallas_call(
        _make_blur_kernel(H, W, K),
        out_shape=jax.ShapeDtypeStruct((P, H, W), x.dtype),
        grid=grid,
        in_specs=[
            pl.BlockSpec(memory_space=pltpu.MemorySpace.SMEM),   # Gaussian taps
            pl.BlockSpec((G, H, W), lambda i: (i, 0, 0)),        # G planes per step
        ],
        out_specs=pl.BlockSpec((G, H, W), lambda i: (i, 0, 0)),
        scratch_shapes=[
            pltpu.VMEM((G, Hp, Wp), jnp.float32),  # reflect-padded slab
            pltpu.VMEM((G, Hp, W), jnp.float32),   # horizontal-pass accumulator
        ],
        compiler_params=pltpu.CompilerParams(
            dimension_semantics=("parallel",),
            vmem_limit_bytes=32 * 1024 * 1024,     # >= v5e's 16 MiB scoped default, safe on v7x
        ),
    )(w_arr, x_flat)
    return out_flat.reshape(N, C, H, W)


# ---------------------------------------------------------------------------
# Module wrapper
# ---------------------------------------------------------------------------
class Blur:
    """JAX/Pallas port of the PyTorch Blur noise layer (GaussianBlur)."""

    def __init__(self, kernel_size, variance_range, key=None):
        self.kernel_size = kernel_size
        self.variance_range = variance_range
        self._key = key if key is not None else jax.random.PRNGKey(0)
        self.last_sigma = None  # kept only so the test can rebuild the reference

    def __str__(self):
        return f"Blur({self.kernel_size},{self.variance_range})"

    def __call__(self, noised_and_cover):
        noised_image = noised_and_cover[0]
        cover_image = noised_and_cover[1]
        lo, hi = self.variance_range
        # torchvision resamples sigma uniformly per call -> split the key every call.
        self._key, sub = jax.random.split(self._key)
        sigma = jax.random.uniform(sub, (), minval=lo, maxval=hi, dtype=jnp.float32)
        self.last_sigma = sigma
        weights = _gaussian_kernel1d_jnp(self.kernel_size, sigma)  # traced; no host sync
        noised_image = gaussian_blur_pallas(noised_image, self.kernel_size, weights)
        return [noised_image, cover_image]


# ---------------------------------------------------------------------------
# Pure-numpy reference (separable gaussian blur, reflect padding)
# ---------------------------------------------------------------------------
def _numpy_reference(x, kernel_size, sigma):
    N, C, H, W = x.shape
    pad = kernel_size // 2
    w = _gaussian_kernel1d_np(kernel_size, sigma)
    xp = np.pad(np.asarray(x, dtype=np.float32),
                ((0, 0), (0, 0), (pad, pad), (pad, pad)), mode="reflect")
    acc_h = np.zeros((N, C, H + 2 * pad, W), dtype=np.float32)
    for t in range(kernel_size):
        acc_h += w[t] * xp[:, :, :, t:t + W]
    out = np.zeros((N, C, H, W), dtype=np.float32)
    for t in range(kernel_size):
        out += w[t] * acc_h[:, :, t:t + H, :]
    return out


if __name__ == "__main__":
    key = jax.random.PRNGKey(0)
    k1, k2 = jax.random.split(key)
    noised = jax.random.normal(k1, (2, 4, 16, 16), dtype=jnp.float32)
    cover = jax.random.normal(k2, (2, 4, 16, 16), dtype=jnp.float32)

    kernel_size = 5
    variance_range = (0.5, 2.0)
    blur = Blur(kernel_size, variance_range, key=jax.random.PRNGKey(0))

    out = blur([noised, cover])
    out_noised = jax.block_until_ready(out[0])
    out_cover = jax.block_until_ready(out[1])

    # correctness check against the numpy reference with the same sampled sigma
    sigma = float(blur.last_sigma)
    ref = _numpy_reference(np.asarray(noised), kernel_size, sigma)
    assert np.allclose(np.asarray(out_noised), ref, rtol=1e-4, atol=1e-4), "blur mismatch"
    assert np.array_equal(np.asarray(out_cover), np.asarray(cover)), "cover must pass through"

    print("KERNEL_OK")
</pallas_src>

<mosaic_0001>
module attributes {stable_mosaic.version = 11 : i64} {
  func.func @blur_kernel(%arg0: i32, %arg1: memref<5xf32, #tpu.memory_space<smem>>, %arg2: memref<4x16x16xf32, #tpu.memory_space<vmem>>, %arg3: memref<4x16x16xf32, #tpu.memory_space<vmem>>, %arg4: memref<4x20x20xf32, #tpu.memory_space<vmem>>, %arg5: memref<4x20x16xf32, #tpu.memory_space<vmem>>) attributes {dimension_semantics = [#tpu.dimension_semantics<parallel>], iteration_bounds = array<i64: 2>, scalar_prefetch = 0 : i64, scratch_operands = 2 : i64, tpu.core_type = #tpu.core_type<tc>, window_params = [{transform_indices = @transform_0, window_bounds = array<i64: 5>}, {transform_indices = @transform_1, window_bounds = array<i64: 4, 16, 16>}, {transform_indices = @transform_2, window_bounds = array<i64: 4, 16, 16>}]} {
    %c0 = arith.constant 0 : index
    %c0_0 = arith.constant 0 : index
    %c0_1 = arith.constant 0 : index
    %0 = vector.load %arg2[%c0, %c0_0, %c0_1] : memref<4x16x16xf32, #tpu.memory_space<vmem>>, vector<4x16x16xf32>
    %c0_2 = arith.constant 0 : index
    %c2 = arith.constant 2 : index
    %c2_3 = arith.constant 2 : index
    %1 = vector.load %arg4[%c0_2, %c2, %c2_3] : memref<4x20x20xf32, #tpu.memory_space<vmem>>, vector<4x16x16xf32>
    tpu.vector_store %arg4[%c0_2, %c2, %c2_3], %0 {strides = array<i32>} : memref<4x20x20xf32, #tpu.memory_space<vmem>>, vector<4x16x16xf32>,
    %c0_4 = arith.constant 0 : index
    %c0_5 = arith.constant 0 : index
    %c2_6 = arith.constant 2 : index
    %2 = vector.load %arg2[%c0_4, %c0_5, %c2_6] : memref<4x16x16xf32, #tpu.memory_space<vmem>>, vector<4x16x1xf32>
    %c0_7 = arith.constant 0 : index
    %c2_8 = arith.constant 2 : index
    %c0_9 = arith.constant 0 : index
    %3 = vector.load %arg4[%c0_7, %c2_8, %c0_9] : memref<4x20x20xf32, #tpu.memory_space<vmem>>, vector<4x16x1xf32>
    tpu.vector_store %arg4[%c0_7, %c2_8, %c0_9], %2 {strides = array<i32>} : memref<4x20x20xf32, #tpu.memory_space<vmem>>, vector<4x16x1xf32>,
    %c0_10 = arith.constant 0 : index
    %c0_11 = arith.constant 0 : index
    %c14 = arith.constant 14 : index
    %4 = vector.load %arg2[%c0_10, %c0_11, %c14] : memref<4x16x16xf32, #tpu.memory_space<vmem>>, vector<4x16x1xf32>
    %c0_12 = arith.constant 0 : index
    %c2_13 = arith.constant 2 : index
    %c18 = arith.constant 18 : index
    %5 = vector.load %arg4[%c0_12, %c2_13, %c18] : memref<4x20x20xf32, #tpu.memory_space<vmem>>, vector<4x16x1xf32>
    tpu.vector_store %arg4[%c0_12, %c2_13, %c18], %4 {strides = array<i32>} : memref<4x20x20xf32, #tpu.memory_space<vmem>>, vector<4x16x1xf32>,
    %c0_14 = arith.constant 0 : index
    %c0_15 = arith.constant 0 : index
    %c1 = arith.constant 1 : index
    %6 = vector.load %arg2[%c0_14, %c0_15, %c1] : memref<4x16x16xf32, #tpu.memory_space<vmem>>, vector<4x16x1xf32>
    %c0_16 = arith.constant 0 : index
    %c2_17 = arith.constant 2 : index
    %c1_18 = arith.constant 1 : index
    %7 = vector.load %arg4[%c0_16, %c2_17, %c1_18] : memref<4x20x20xf32, #tpu.memory_space<vmem>>, vector<4x16x1xf32>
    tpu.vector_store %arg4[%c0_16, %c2_17, %c1_18], %6 {strides = array<i32>} : memref<4x20x20xf32, #tpu.memory_space<vmem>>, vector<4x16x1xf32>,
    %c0_19 = arith.constant 0 : index
    %c0_20 = arith.constant 0 : index
    %c13 = arith.constant 13 : index
    %8 = vector.load %arg2[%c0_19, %c0_20, %c13] : memref<4x16x16xf32, #tpu.memory_space<vmem>>, vector<4x16x1xf32>
    %c0_21 = arith.constant 0 : index
    %c2_22 = arith.constant 2 : index
    %c19 = arith.constant 19 : index
    %9 = vector.load %arg4[%c0_21, %c2_22, %c19] : memref<4x20x20xf32, #tpu.memory_space<vmem>>, vector<4x16x1xf32>
    tpu.vector_store %arg4[%c0_21, %c2_22, %c19], %8 {strides = array<i32>} : memref<4x20x20xf32, #tpu.memory_space<vmem>>, vector<4x16x1xf32>,
    %c0_23 = arith.constant 0 : index
    %c4 = arith.constant 4 : index
    %c0_24 = arith.constant 0 : index
    %10 = vector.load %arg4[%c0_23, %c4, %c0_24] : memref<4x20x20xf32, #tpu.memory_space<vmem>>, vector<4x1x20xf32>
    %c0_25 = arith.constant 0 : index
    %c0_26 = arith.constant 0 : index
    %c0_27 = arith.constant 0 : index
    %11 = vector.load %arg4[%c0_25, %c0_26, %c0_27] : memref<4x20x20xf32, #tpu.memory_space<vmem>>, vector<4x1x20xf32>
    tpu.vector_store %arg4[%c0_25, %c0_26, %c0_27], %10 {strides = array<i32>} : memref<4x20x20xf32, #tpu.memory_space<vmem>>, vector<4x1x20xf32>,
    %c0_28 = arith.constant 0 : index
    %c16 = arith.constant 16 : index
    %c0_29 = arith.constant 0 : index
    %12 = vector.load %arg4[%c0_28, %c16, %c0_29] : memref<4x20x20xf32, #tpu.memory_space<vmem>>, vector<4x1x20xf32>
    %c0_30 = arith.constant 0 : index
    %c18_31 = arith.constant 18 : index
    %c0_32 = arith.constant 0 : index
    %13 = vector.load %arg4[%c0_30, %c18_31, %c0_32] : memref<4x20x20xf32, #tpu.memory_space<vmem>>, vector<4x1x20xf32>
    tpu.vector_store %arg4[%c0_30, %c18_31, %c0_32], %12 {strides = array<i32>} : memref<4x20x20xf32, #tpu.memory_space<vmem>>, vector<4x1x20xf32>,
    %c0_33 = arith.constant 0 : index
    %c3 = arith.constant 3 : index
    %c0_34 = arith.constant 0 : index
    %14 = vector.load %arg4[%c0_33, %c3, %c0_34] : memref<4x20x20xf32, #tpu.memory_space<vmem>>, vector<4x1x20xf32>
    %c0_35 = arith.constant 0 : index
    %c1_36 = arith.constant 1 : index
    %c0_37 = arith.constant 0 : index
    %15 = vector.load %arg4[%c0_35, %c1_36, %c0_37] : memref<4x20x20xf32, #tpu.memory_space<vmem>>, vector<4x1x20xf32>
    tpu.vector_store %arg4[%c0_35, %c1_36, %c0_37], %14 {strides = array<i32>} : memref<4x20x20xf32, #tpu.memory_space<vmem>>, vector<4x1x20xf32>,
    %c0_38 = arith.constant 0 : index
    %c15 = arith.constant 15 : index
    %c0_39 = arith.constant 0 : index
    %16 = vector.load %arg4[%c0_38, %c15, %c0_39] : memref<4x20x20xf32, #tpu.memory_space<vmem>>, vector<4x1x20xf32>
    %c0_40 = arith.constant 0 : index
    %c19_41 = arith.constant 19 : index
    %c0_42 = arith.constant 0 : index
    %17 = vector.load %arg4[%c0_40, %c19_41, %c0_42] : memref<4x20x20xf32, #tpu.memory_space<vmem>>, vector<4x1x20xf32>
    tpu.vector_store %arg4[%c0_40, %c19_41, %c0_42], %16 {strides = array<i32>} : memref<4x20x20xf32, #tpu.memory_space<vmem>>, vector<4x1x20xf32>,
    %c0_43 = arith.constant 0 : index
    %18 = memref.load %arg1[%c0_43] : memref<5xf32, #tpu.memory_space<smem>>
    %c0_44 = arith.constant 0 : index
    %c0_45 = arith.constant 0 : index
    %c0_46 = arith.constant 0 : index
    %19 = vector.load %arg4[%c0_44, %c0_45, %c0_46] : memref<4x20x20xf32, #tpu.memory_space<vmem>>, vector<4x20x16xf32>
    %20 = vector.broadcast %18 : f32 to vector<4x20x16xf32>
    %21 = arith.mulf %20, %19 : vector<4x20x16xf32>
    %c1_47 = arith.constant 1 : index
    %22 = memref.load %arg1[%c1_47] : memref<5xf32, #tpu.memory_space<smem>>
    %c0_48 = arith.constant 0 : index
    %c0_49 = arith.constant 0 : index
    %c1_50 = arith.constant 1 : index
    %23 = vector.load %arg4[%c0_48, %c0_49, %c1_50] : memref<4x20x20xf32, #tpu.memory_space<vmem>>, vector<4x20x16xf32>
    %24 = vector.broadcast %22 : f32 to vector<4x20x16xf32>
    %25 = arith.mulf %24, %23 : vector<4x20x16xf32>
    %26 = arith.addf %21, %25 : vector<4x20x16xf32>
    %c2_51 = arith.constant 2 : index
    %27 = memref.load %arg1[%c2_51] : memref<5xf32, #tpu.memory_space<smem>>
    %c0_52 = arith.constant 0 : index
    %c0_53 = arith.constant 0 : index
    %c2_54 = arith.constant 2 : index
    %28 = vector.load %arg4[%c0_52, %c0_53, %c2_54] : memref<4x20x20xf32, #tpu.memory_space<vmem>>, vector<4x20x16xf32>
    %29 = vector.broadcast %27 : f32 to vector<4x20x16xf32>
    %30 = arith.mulf %29, %28 : vector<4x20x16xf32>
    %31 = arith.addf %26, %30 : vector<4x20x16xf32>
    %c3_55 = arith.constant 3 : index
    %32 = memref.load %arg1[%c3_55] : memref<5xf32, #tpu.memory_space<smem>>
    %c0_56 = arith.constant 0 : index
    %c0_57 = arith.constant 0 : index
    %c3_58 = arith.constant 3 : index
    %33 = vector.load %arg4[%c0_56, %c0_57, %c3_58] : memref<4x20x20xf32, #tpu.memory_space<vmem>>, vector<4x20x16xf32>
    %34 = vector.broadcast %32 : f32 to vector<4x20x16xf32>
    %35 = arith.mulf %34, %33 : vector<4x20x16xf32>
    %36 = arith.addf %31, %35 : vector<4x20x16xf32>
    %c4_59 = arith.constant 4 : index
    %37 = memref.load %arg1[%c4_59] : memref<5xf32, #tpu.memory_space<smem>>
    %c0_60 = arith.constant 0 : index
    %c0_61 = arith.constant 0 : index
    %c4_62 = arith.constant 4 : index
    %38 = vector.load %arg4[%c0_60, %c0_61, %c4_62] : memref<4x20x20xf32, #tpu.memory_space<vmem>>, vector<4x20x16xf32>
    %39 = vector.broadcast %37 : f32 to vector<4x20x16xf32>
    %40 = arith.mulf %39, %38 : vector<4x20x16xf32>
    %41 = arith.addf %36, %40 : vector<4x20x16xf32>
    %c0_63 = arith.constant 0 : index
    %c0_64 = arith.constant 0 : index
    %c0_65 = arith.constant 0 : index
    %42 = vector.load %arg5[%c0_63, %c0_64, %c0_65] : memref<4x20x16xf32, #tpu.memory_space<vmem>>, vector<4x20x16xf32>
    tpu.vector_store %arg5[%c0_63, %c0_64, %c0_65], %41 {strides = array<i32>} : memref<4x20x16xf32, #tpu.memory_space<vmem>>, vector<4x20x16xf32>,
    %c0_66 = arith.constant 0 : index
    %43 = memref.load %arg1[%c0_66] : memref<5xf32, #tpu.memory_space<smem>>
    %c0_67 = arith.constant 0 : index
    %c0_68 = arith.constant 0 : index
    %c0_69 = arith.constant 0 : index
    %44 = vector.load %arg5[%c0_67, %c0_68, %c0_69] : memref<4x20x16xf32, #tpu.memory_space<vmem>>, vector<4x16x16xf32>
    %45 = vector.broadcast %43 : f32 to vector<4x16x16xf32>
    %46 = arith.mulf %45, %44 : vector<4x16x16xf32>
    %c1_70 = arith.constant 1 : index
    %47 = memref.load %arg1[%c1_70] : memref<5xf32, #tpu.memory_space<smem>>
    %c0_71 = arith.constant 0 : index
    %c1_72 = arith.constant 1 : index
    %c0_73 = arith.constant 0 : index
    %48 = vector.load %arg5[%c0_71, %c1_72, %c0_73] : memref<4x20x16xf32, #tpu.memory_space<vmem>>, vector<4x16x16xf32>
    %49 = vector.broadcast %47 : f32 to vector<4x16x16xf32>
    %50 = arith.mulf %49, %48 : vector<4x16x16xf32>
    %51 = arith.addf %46, %50 : vector<4x16x16xf32>
    %c2_74 = arith.constant 2 : index
    %52 = memref.load %arg1[%c2_74] : memref<5xf32, #tpu.memory_space<smem>>
    %c0_75 = arith.constant 0 : index
    %c2_76 = arith.constant 2 : index
    %c0_77 = arith.constant 0 : index
    %53 = vector.load %arg5[%c0_75, %c2_76, %c0_77] : memref<4x20x16xf32, #tpu.memory_space<vmem>>, vector<4x16x16xf32>
    %54 = vector.broadcast %52 : f32 to vector<4x16x16xf32>
    %55 = arith.mulf %54, %53 : vector<4x16x16xf32>
    %56 = arith.addf %51, %55 : vector<4x16x16xf32>
    %c3_78 = arith.constant 3 : index
    %57 = memref.load %arg1[%c3_78] : memref<5xf32, #tpu.memory_space<smem>>
    %c0_79 = arith.constant 0 : index
    %c3_80 = arith.constant 3 : index
    %c0_81 = arith.constant 0 : index
    %58 = vector.load %arg5[%c0_79, %c3_80, %c0_81] : memref<4x20x16xf32, #tpu.memory_space<vmem>>, vector<4x16x16xf32>
    %59 = vector.broadcast %57 : f32 to vector<4x16x16xf32>
    %60 = arith.mulf %59, %58 : vector<4x16x16xf32>
    %61 = arith.addf %56, %60 : vector<4x16x16xf32>
    %c4_82 = arith.constant 4 : index
    %62 = memref.load %arg1[%c4_82] : memref<5xf32, #tpu.memory_space<smem>>
    %c0_83 = arith.constant 0 : index
    %c4_84 = arith.constant 4 : index
    %c0_85 = arith.constant 0 : index
    %63 = vector.load %arg5[%c0_83, %c4_84, %c0_85] : memref<4x20x16xf32, #tpu.memory_space<vmem>>, vector<4x16x16xf32>
    %64 = vector.broadcast %62 : f32 to vector<4x16x16xf32>
    %65 = arith.mulf %64, %63 : vector<4x16x16xf32>
    %66 = arith.addf %61, %65 : vector<4x16x16xf32>
    %c0_86 = arith.constant 0 : index
    %c0_87 = arith.constant 0 : index
    %c0_88 = arith.constant 0 : index
    %67 = vector.load %arg3[%c0_86, %c0_87, %c0_88] : memref<4x16x16xf32, #tpu.memory_space<vmem>>, vector<4x16x16xf32>
    tpu.vector_store %arg3[%c0_86, %c0_87, %c0_88], %66 {strides = array<i32>} : memref<4x16x16xf32, #tpu.memory_space<vmem>>, vector<4x16x16xf32>,
    return
  }
  func.func @transform_0(%arg0: i32) -> i32 {
    %c0_i32 = arith.constant 0 : i32
    %c0_i32_0 = arith.constant 0 : i32
    return %c0_i32 : i32
  }
  func.func @transform_1(%arg0: i32) -> (i32, i32, i32) {
    %c0_i32 = arith.constant 0 : i32
    %c0_i32_0 = arith.constant 0 : i32
    %c0_i32_1 = arith.constant 0 : i32
    return %arg0, %c0_i32, %c0_i32_0 : i32, i32, i32
  }
  func.func @transform_2(%arg0: i32) -> (i32, i32, i32) {
    %c0_i32 = arith.constant 0 : i32
    %c0_i32_0 = arith.constant 0 : i32
    %c0_i32_1 = arith.constant 0 : i32
    return %arg0, %c0_i32, %c0_i32_0 : i32, i32, i32
  }
}

</mosaic_0001>

<bundles_post_ra>
// kernel: tpu_custom_call.1
= control target key start
LH: loop header
LB: loop body
LE: loop exit
PB: predicated region body
PF: predicated region fallthrough
CT: control target
= control target key end

     0   :  { %7 = vsyncpa [#allocation7], 0  ;;  %s1845_s0 = inlined_call_operand.hbm [shape: f32[5], index: 0, kind: input, shape index: {}]   ;;  %s1846_s1 = inlined_call_operand.hbm [shape: f32[8,16,16], index: 1, kind: input, shape index: {}]   ;;  %s1847_s2 = inlined_call_operand.hbm [shape: f32[8,16,16], index: 2, kind: output, shape index: {}]  }
   0x1   :  { %8 = vsyncpa [#allocation5], 0 }
   0x2   :  { %10 = vsyncpa [#allocation5 + $0x1], 0 }
   0x3   :  { %11 = vsyncpa [#allocation6], 0 }
   0x4   :  { %13 = vsyncpa [#allocation6 + $0x1], 0  ;;  %s1231_s9 = smov 0   ;;  %s1233_s10 = smov 0  }
   0x5   :  { %s1235_s11 = smov 0   ;;  %s1237_s12 = smov 0  }
   0x6 LB: > { %s1252_s13 = sadd.s32 4294967295, %s1200_s12   ;;  %s989_s14 = sadd.s32 4294967294, %s1200_s12   ;;  %s1200_s12 = sphi %s1237_s12, %s1867_s12   ;;  %s1196_s11 = sphi %s1235_s11, %s1866_s11   ;;  %s1192_s10 = sphi %s1233_s10, %s1865_s10   ;;  %s1188_s9 = sphi %s1231_s9, %s1864_s9  }
   0x7   : > { %s1256_s15 = sadd.s32 1, %s1200_s12   ;;  %s47_s16 = sadd.s32 1, %s1196_s11 }
   0x8   : > { %s44_s17 = ssub.s32 %s1200_s12, %s1256_s15  ;;  %p54_p0 = scmp.ne.s32.totalorder %s1196_s11, %s1192_s10 }
   0x9   : > { %p45_p1 = scmp.eq.s32.totalorder %s44_s17, 0  ;;  %p55_p2 = scmp.eq.s32.totalorder %s1200_s12, 0 }
   0xa   : > { %p60_p3 = scmp.ne.s32.totalorder %s1192_s10, %s1188_s9  ;;  %p1848_p4 = scmp.eq.s32.totalorder %s1252_s13, 0 }
   0xb   : > { %s1268_s18 = scalar_select %p45_p1, %s1196_s11, %s47_s16  }
   0xc   : > { %p1270_p5 = por %p55_p2, %p54_p0  ;;  %p1276_p6 = por %p1848_p4, %p60_p3 }
   0xd   : > { %p84_p7 = scmp.eq.s32.totalorder %s1252_s13, 1  ;;  %p90_p8 = scmp.eq.s32.totalorder %s989_s14, 1 }
   0xe   : > { %s1852_s20 = scalar_select %p1276_p6, 1, 0 }
   0xf   : > { %p990_p9 = scmp.ge.s32.totalorder %s1200_s12, 1  ;;  %p97_p10 = scmp.lt.s32.totalorder %s1200_s12, 3 }
  0x10   : > { %p1283_p11 = por %p84_p7, %p54_p0  ;;  %p1287_p12 = por %p90_p8, %p60_p3 }
  0x11   : > { %p1291_p13 = pnand %p990_p9, %p97_p10  ;;  %p1040_p4 = scmp.lt.s32.totalorder %s1200_s12, 2 }
  0x12   : > { %s1853_s21 = scalar_select %p1283_p11, 1, 0 }
  0x13   : > { %s1854_s22 = scalar_select %p1287_p12, 1, 0 }
  0x14   : > { %p1027_p2 = pneg %p1291_p13  ;;  %s119_s24 = sand.u32 1, %s1196_s11  }
  0x15   : > { %s1016_s25 = sshll.u32 %s1200_s12, 10  ;;  %p1856_p6 = scmp.eq.s32.totalorder %s1252_s13, 0 }
  0x16   : > { %p1305_p7 = pnand %p1040_p4, %p1270_p5  ;;  %s993_s27 = sshll.u32 %s119_s24, 6 }
  0x17   : > { %p1028_p0 = pnand %p1027_p2, %p1856_p6  ;;  %s1087_s30 = scalar_lea.hbm %s1845_s0, 16 }
  0x18   : > { %p1088_p3 = scmp.ne.s32.totalorder %s1845_s0, %s1087_s30  ;;  %p1094_p6 = scmp.lt.u32.totalorder %s1087_s30, %s1845_s0 }
  0x19   : > { %p1089_p8 = pneg %p1028_p0 }
  0x1b   : > { %p1090_p9 = pnand %p1089_p8, %p1088_p3 }
  0x1d   : > { %p1091_p10 = pneg %p1090_p9 }
  0x1f   : > { %p1096_p4 = pnand %p1094_p6, %p1091_p10 }
  0x21   : > { %1099 = shalt.err (!%p1096_p4)
}
  0x22   : > { %s1202_s7 = smov [#allocation4]   ;;  %s1324_s19 = scalar_lea.hbm %s1846_s1, %s1016_s25 }
  0x23   : > { %1030 = dma.hbm_to_smem (!%p1028_p0), %s1845_s0, 16, %s1202_s7, [#allocation7]  }
  0x24   : > { %s123_s28 = scalar_lea.vmem [#allocation8], %s993_s27  ;;  %s1328_s30 = scalar_lea.sflag [#allocation5], %s119_s24 }
  0x25   : > { %s131_s29 = sshll.u32 %s123_s28, 4  ;;  %s1100_s3 = scalar_lea.hbm %s1324_s19, 1024  ;;  %s1326_s29 = int_to_ptr.vmem [resolvable:$true] %s131_s29 }
  0x26   : > { %p1101_p5 = scmp.ne.s32.totalorder %s1324_s19, %s1100_s3  ;;  %p1102_p2 = pneg %p1305_p7 }
  0x27   : > { %s1105_s5 = scalar_lea.hbm %s1846_s1, 2048  ;;  %p1106_p8 = scmp.lt.u32.totalorder %s1324_s19, %s1846_s1 }
  0x28   : > { %p1103_p0 = pnand %p1102_p2, %p1101_p5  ;;  %p1107_p9 = scmp.lt.u32.totalorder %s1105_s5, %s1100_s3 }
  0x29   : > { %p1109_p6 = scmp.lt.u32.totalorder %s1100_s3, %s1324_s19 }
  0x2a   : > { %p1104_p3 = pneg %p1103_p0  ;;  %p1108_p10 = por %p1107_p9, %p1106_p8 }
  0x2c   : > { %p1110_p4 = por %p1109_p6, %p1108_p10 }
  0x2e   : > { %p1111_p1 = pnand %p1110_p4, %p1104_p3 }
  0x30   : > { %1114 = shalt.err (!%p1111_p1)
}
  0x31   : > { %s1115_s24 = scalar_lea.vmem %s1326_s29, 1024  ;;  %s1203_s27 = smov [#allocation8]  }
  0x32   : > { %p1116_p5 = scmp.ne.s32.totalorder %s1326_s29, %s1115_s24  ;;  %s1120_s8 = sshll.u32 %s1203_s27, 4  ;;  %s1121_s8 = int_to_ptr.vmem [resolvable:$false] %s1120_s8 }
  0x33   : > { %s1122_s14 = scalar_lea.vmem %s1121_s8, 2048  ;;  %p1123_p11 = scmp.lt.s32.totalorder %s1326_s29, %s1121_s8 }
  0x34   : > { %p1118_p0 = pnand %p1116_p5, %p1102_p2  ;;  %p1124_p8 = scmp.lt.s32.totalorder %s1122_s14, %s1115_s24 }
  0x36   : > { %p1119_p12 = pneg %p1118_p0  ;;  %p1125_p9 = por %p1124_p8, %p1123_p11 }
  0x38   : > { %p1126_p10 = pnand %p1125_p9, %p1119_p12 }
  0x3a   : > { %1129 = shalt.err (!%p1126_p10)
}
  0x3b   : > { %s1204_s16 = smov 128   ;;  %s1205_s17 = smov 8  }
  0x3c   : > { %1034 = dma.hbm_to_vmem [thread:$0]  (!%p1305_p7), %s1324_s19, 1024, %s1326_s29, %s1328_s30, %s1204_s16, %s1204_s16, %s1205_s17  }
  0x3d   : > { %143 = sbr.rel (%p1291_p13) target bundleno = 504 (0x1f8), region = 28  ;;  %p1858_p1 = scmp.eq.s32.totalorder (!%p1291_p13), %s1252_s13, 0 }
  0x44   : > { %1175 = dma.done.wait (%p1858_p1), [#allocation7], 16   ;;  %p1859_p2 = pmov %p1858_p1 }
  0x45   : > { %s1363_s28 = sand.u32 1, %s1192_s10   ;;  %p1860_p11 = scmp.ne.s32.totalorder %s1852_s20, 0 }
  0x46   : > { %1177 = vsyncadd (%p1859_p2), [#allocation7], 4294967280  ;;  %s999_s3 = sshll.u32 %s1363_s28, 6  ;;  %s150_s25 = scalar_lea.sflag [#allocation5], %s1363_s28 }
  0x47   : > { %s153_s26 = scalar_lea.vmem [#allocation8], %s999_s3 }
  0x48   : > { %1179 = dma.done.wait (%p1860_p11), %s150_s25, 1024  }
  0x49   : > { %1181 = vsyncadd (%p1860_p11), %s150_s25, 4294966272 }
  0x4a   : > { %158 = sfence }
  0x4b   : > { %v1373_v0 = vld [vmem:[%s153_s26 + $0x10] sm:$0xff]  ;;  %v1375_v1 = vld [vmem:[%s153_s26] sm:$0xff]  ;;  %s1206_s23 = smov 2   ;;  %v1379_v2 = vld [vmem:[%s153_s26 + $0x18] sm:$0xff]  ;;  %s1207_s20 = smov 126   ;;  %vm217_vm0 = vcmask 146448  }
  0x4c   : > { %197 = vrot.lane.b32.xlu1 %v1373_v0, %s1206_s23  ;;  %193 = vrot.lane.b32.xlu0 %v1375_v1, %s1206_s23  ;;  %v1381_v3 = vld [vmem:[%s153_s26 + $0x8] sm:$0xff]  ;;  %v1387_v5 = vld [vmem:[%s153_s26 + $0x20] sm:$0xff]  ;;  %s1208_s19 = smov 4   ;;  %s1209_s29 = smov 6   ;;  %vm266_vm1 = vcmask 7168   ;;  %vm315_vm2 = vcmask 154768  }
  0x4d   : > { %v1385_v4 = vld [vmem:[%s153_s26 + $0x28] sm:$0xff]  ;;  %v1391_v6 = vld [vmem:[%s153_s26 + $0x38] sm:$0xff]  ;;  %v1393_v7 = vld [vmem:[%s153_s26 + $0x30] sm:$0xff]  ;;  %vm332_vm3 = vcmask 15368   ;;  %vm381_vm4 = vcmask 162968   ;;  %s1001_s30 = sld [smem:[#allocation4 + $0x1]] }
  0x4e   : > { %vm394_vm5 = vcmask 155648   ;;  %s1002_s4 = sld [smem:[#allocation4 + $0x2]]  ;;  %s1210_s5 = smov 127   ;;  %vm745_vm6 = vcmask 130048   ;;  %vm748_vm7 = vcmask 125952  }
  0x4f   : > { %s1003_s6 = sld [smem:[#allocation4 + $0x3]]  ;;  %s1004_s7 = sld [smem:[#allocation4 + $0x4]] }
  0x50   : > { %199 = vrot.lane.b32.xlu1 %v1379_v2, %s1206_s23  ;;  %195 = vrot.lane.b32.xlu0 %v1381_v3, %s1206_s23  ;;  %s1211_s24 = smov 125   ;;  %s1212_s27 = smov 124  }
  0x51   : > { %s423_s8 = sld [smem:[#allocation4]]  ;;  %s1749_s14 = scalar_lea.vmem [#allocation9], %s999_s3 }
  0x52   : > { %s1018_s16 = sshll.u32 %s1252_s13, 10  ;;  %s904_s17 = sshll.u32 %s1749_s14, 4  ;;  %s1797_s17 = int_to_ptr.vmem [resolvable:$true] %s904_s17 }
  0x53   : > { %v1473_v36 = vstv %s1001_s30  ;;  %s1795_s26 = scalar_lea.hbm %s1847_s2, %s1018_s16  ;;  %s890_s13 = scalar_lea.sflag [#allocation6], %s1363_s28 }
  0x54   : > { %203 = vrot.lane.b32.xlu1 %v1385_v4, %s1206_s23  ;;  %201 = vrot.lane.b32.xlu0 %v1387_v5, %s1206_s23  ;;  %v1505_v59 = vstv %s1002_s4  ;;  %p1861_p13 = scmp.ne.s32.totalorder %s1853_s21, 0 }
  0x58   : > { %207 = vrot.lane.b32.xlu1 %v1391_v6, %s1206_s23  ;;  %205 = vrot.lane.b32.xlu0 %v1393_v7, %s1206_s23  ;;  %s1130_s23 = scalar_lea.vmem %s1797_s17, 1024 }
  0x59   : > { %p1131_p12 = scmp.ne.s32.totalorder %s1797_s17, %s1130_s23 }
  0x5b   : > { %p1132_p7 = pnand %p1131_p12, %p1861_p13 }
  0x5c   : > { %244 = vrot.lane.b32.xlu1 %v1381_v3, %s1207_s20  ;;  %242 = vrot.lane.b32.xlu0 %v1375_v1, %s1207_s20 }
  0x5d   : > { %p1133_p3 = pneg %p1132_p7 }
  0x60   : > { %248 = vrot.lane.b32.xlu1 %v1379_v2, %s1207_s20  ;;  %246 = vrot.lane.b32.xlu0 %v1373_v0, %s1207_s20 }
  0x64   : > { %252 = vrot.lane.b32.xlu1 %v1385_v4, %s1207_s20  ;;  %250 = vrot.lane.b32.xlu0 %v1387_v5, %s1207_s20 }
  0x68   : > { %256 = vrot.lane.b32.xlu1 %v1391_v6, %s1207_s20  ;;  %254 = vrot.lane.b32.xlu0 %v1393_v7, %s1207_s20 }
  0x6c   : > { %293 = vrot.lane.b32.xlu1 %v1381_v3, %s1208_s19  ;;  %291 = vrot.lane.b32.xlu0 %v1375_v1, %s1208_s19 }
  0x70   : > { %297 = vrot.lane.b32.xlu1 %v1379_v2, %s1208_s19  ;;  %295 = vrot.lane.b32.xlu0 %v1373_v0, %s1208_s19 }
  0x74   : > { %301 = vrot.lane.b32.xlu1 %v1385_v4, %s1208_s19  ;;  %299 = vrot.lane.b32.xlu0 %v1387_v5, %s1208_s19 }
  0x78   : > { %305 = vrot.lane.b32.xlu1 %v1391_v6, %s1208_s19  ;;  %303 = vrot.lane.b32.xlu0 %v1393_v7, %s1208_s19 }
  0x7c   : > { %359 = vrot.lane.b32.xlu1 %v1381_v3, %s1209_s29  ;;  %357 = vrot.lane.b32.xlu0 %v1375_v1, %s1209_s29 }
  0x80   : > { %363 = vrot.lane.b32.xlu1 %v1379_v2, %s1209_s29  ;;  %361 = vrot.lane.b32.xlu0 %v1373_v0, %s1209_s29 }
  0x84   : > { %367 = vrot.lane.b32.xlu1 %v1385_v4, %s1209_s29  ;;  %365 = vrot.lane.b32.xlu0 %v1387_v5, %s1209_s29 }
  0x88   : > { %371 = vrot.lane.b32.xlu1 %v1391_v6, %s1209_s29  ;;  %369 = vrot.lane.b32.xlu0 %v1393_v7, %s1209_s29 }
  0xbe   : > { %v198_v8 = vpop.permute.xlu1 %197  ;;  %v194_v9 = vpop.permute.xlu0 %193 }
  0xbf   : > { %220 = vst.msk [vmem:[#allocation2 + $0x1a] sm:$0xff] %vm217_vm0, %v198_v8  ;;  %218 = vst.msk [vmem:[#allocation2 + $0x2] sm:$0xff] %vm217_vm0, %v194_v9 }
  0xc2   : > { %v200_v10 = vpop.permute.xlu1 %199  ;;  %v196_v11 = vpop.permute.xlu0 %195 }
  0xc3   : > { %221 = vst.msk [vmem:[#allocation2 + $0x22] sm:$0xff] %vm217_vm0, %v200_v10  ;;  %219 = vst.msk [vmem:[#allocation2 + $0xa] sm:$0xff] %vm217_vm0, %v196_v11  ;;  %v1538_v10 = vstv %s1004_s7 }
  0xc6   : > { %v204_v12 = vpop.permute.xlu1 %203  ;;  %v202_v13 = vpop.permute.xlu0 %201 }
  0xc7   : > { %223 = vst.msk [vmem:[#allocation2 + $0x3a] sm:$0xff] %vm217_vm0, %v204_v12  ;;  %222 = vst.msk [vmem:[#allocation2 + $0x32] sm:$0xff] %vm217_vm0, %v202_v13 }
  0xca   : > { %v208_v14 = vpop.permute.xlu1 %207  ;;  %v206_v15 = vpop.permute.xlu0 %205 }
  0xcb   : > { %225 = vst.msk [vmem:[#allocation2 + $0x52] sm:$0xff] %vm217_vm0, %v208_v14  ;;  %224 = vst.msk [vmem:[#allocation2 + $0x4a] sm:$0xff] %vm217_vm0, %v206_v15 }
  0xce   : > { %v245_v16 = vpop.permute.xlu1 %244  ;;  %v243_v17 = vpop.permute.xlu0 %242 }
  0xcf   : > { %268 = vst.msk [vmem:[#allocation2 + $0xa] sm:$0xff] %vm266_vm1, %v245_v16  ;;  %267 = vst.msk [vmem:[#allocation2 + $0x2] sm:$0xff] %vm266_vm1, %v243_v17 }
  0xd2   : > { %v249_v18 = vpop.permute.xlu1 %248  ;;  %v247_v19 = vpop.permute.xlu0 %246 }
  0xd3   : > { %270 = vst.msk [vmem:[#allocation2 + $0x22] sm:$0xff] %vm266_vm1, %v249_v18  ;;  %269 = vst.msk [vmem:[#allocation2 + $0x1a] sm:$0xff] %vm266_vm1, %v247_v19 }
  0xd6   : > { %v253_v20 = vpop.permute.xlu1 %252  ;;  %v251_v21 = vpop.permute.xlu0 %250 }
  0xd7   : > { %272 = vst.msk [vmem:[#allocation2 + $0x3a] sm:$0xff] %vm266_vm1, %v253_v20  ;;  %271 = vst.msk [vmem:[#allocation2 + $0x32] sm:$0xff] %vm266_vm1, %v251_v21 }
  0xda   : > { %v257_v22 = vpop.permute.xlu1 %256  ;;  %v255_v23 = vpop.permute.xlu0 %254 }
  0xdb   : > { %274 = vst.msk [vmem:[#allocation2 + $0x52] sm:$0xff] %vm266_vm1, %v257_v22  ;;  %273 = vst.msk [vmem:[#allocation2 + $0x4a] sm:$0xff] %vm266_vm1, %v255_v23 }
  0xde   : > { %v294_v24 = vpop.permute.xlu1 %293  ;;  %v292_v25 = vpop.permute.xlu0 %291 }
  0xdf   : > { %317 = vst.msk [vmem:[#allocation2 + $0xa] sm:$0xff] %vm315_vm2, %v294_v24  ;;  %316 = vst.msk [vmem:[#allocation2 + $0x2] sm:$0xff] %vm315_vm2, %v292_v25 }
  0xe0   : > { %334 = vst.msk [vmem:[#allocation2 + $0xa] sm:$0xff] %vm332_vm3, %v1381_v3  ;;  %333 = vst.msk [vmem:[#allocation2 + $0x2] sm:$0xff] %vm332_vm3, %v1375_v1 }
  0xe2   : > { %v298_v26 = vpop.permute.xlu1 %297  ;;  %v296_v27 = vpop.permute.xlu0 %295 }
  0xe3   : > { %319 = vst.msk [vmem:[#allocation2 + $0x22] sm:$0xff] %vm315_vm2, %v298_v26  ;;  %318 = vst.msk [vmem:[#allocation2 + $0x1a] sm:$0xff] %vm315_vm2, %v296_v27 }
  0xe4   : > { %336 = vst.msk [vmem:[#allocation2 + $0x22] sm:$0xff] %vm332_vm3, %v1379_v2  ;;  %335 = vst.msk [vmem:[#allocation2 + $0x1a] sm:$0xff] %vm332_vm3, %v1373_v0 }
  0xe6   : > { %v302_v28 = vpop.permute.xlu1 %301  ;;  %v300_v29 = vpop.permute.xlu0 %299 }
  0xe7   : > { %321 = vst.msk [vmem:[#allocation2 + $0x3a] sm:$0xff] %vm315_vm2, %v302_v28  ;;  %320 = vst.msk [vmem:[#allocation2 + $0x32] sm:$0xff] %vm315_vm2, %v300_v29 }
  0xe8   : > { %338 = vst.msk [vmem:[#allocation2 + $0x3a] sm:$0xff] %vm332_vm3, %v1385_v4  ;;  %337 = vst.msk [vmem:[#allocation2 + $0x32] sm:$0xff] %vm332_vm3, %v1387_v5  ;;  %v1524_v5 = vstv %s1003_s6 }
  0xea   : > { %v306_v30 = vpop.permute.xlu1 %305  ;;  %v304_v31 = vpop.permute.xlu0 %303 }
  0xeb   : > { %323 = vst.msk [vmem:[#allocation2 + $0x52] sm:$0xff] %vm315_vm2, %v306_v30  ;;  %322 = vst.msk [vmem:[#allocation2 + $0x4a] sm:$0xff] %vm315_vm2, %v304_v31 }
  0xec   : > { %340 = vst.msk [vmem:[#allocation2 + $0x52] sm:$0xff] %vm332_vm3, %v1391_v6  ;;  %339 = vst.msk [vmem:[#allocation2 + $0x4a] sm:$0xff] %vm332_vm3, %v1393_v7 }
  0xee   : > { %v360_v32 = vpop.permute.xlu1 %359  ;;  %v358_v33 = vpop.permute.xlu0 %357 }
  0xef   : > { %383 = vst.msk [vmem:[#allocation2 + $0xa] sm:$0xff] %vm381_vm4, %v360_v32  ;;  %382 = vst.msk [vmem:[#allocation2 + $0x2] sm:$0xff] %vm381_vm4, %v358_v33 }
  0xf2   : > { %v364_v34 = vpop.permute.xlu1 %363  ;;  %v362_v35 = vpop.permute.xlu0 %361 }
  0xf3   : > { %385 = vst.msk [vmem:[#allocation2 + $0x22] sm:$0xff] %vm381_vm4, %v364_v34  ;;  %384 = vst.msk [vmem:[#allocation2 + $0x1a] sm:$0xff] %vm381_vm4, %v362_v35 }
  0xf6   : > { %v399_v37 = vld [vmem:[#allocation2 + $0x10] sm:$0x1]  ;;  %v415_v38 = vld [vmem:[#allocation2 + $0xf] sm:$0x1]  ;;  %v390_v39 = vld [vmem:[#allocation2 + $0x4] sm:$0x1]  ;;  %v368_v40 = vpop.permute.xlu1 %367  ;;  %v366_v41 = vpop.permute.xlu0 %365 }
  0xf7   : > { %403 = vst.msk [vmem:[#allocation2 + $0x12] sm:$0x1] %vm394_vm5, %v399_v37  ;;  %419 = vst.msk [vmem:[#allocation2 + $0x13] sm:$0x1] %vm394_vm5, %v415_v38  ;;  %v407_v42 = vld [vmem:[#allocation2 + $0x3] sm:$0x1] }
  0xf8   : > { %395 = vst.msk [vmem:[#allocation2] sm:$0x1] %vm394_vm5, %v390_v39  ;;  %v1480_v43 = vld [vmem:[#allocation2 + $0x8] sm:$0xff]  ;;  %411 = vst.msk [vmem:[#allocation2 + $0x1] sm:$0x1] %vm394_vm5, %v407_v42 }
  0xf9   : > { %387 = vst.msk [vmem:[#allocation2 + $0x3a] sm:$0xff] %vm381_vm4, %v368_v40  ;;  %386 = vst.msk [vmem:[#allocation2 + $0x32] sm:$0xff] %vm381_vm4, %v366_v41  ;;  %v452_v44 = vmul.f32 %v1473_v36, %v1480_v43  ;;  %v526_v1 = vmul.f32 %v1505_v59, %v1480_v43  ;;  %v600_v6 = vmul.f32 %v1524_v5, %v1480_v43 }
  0xfa   : > { %v400_v45 = vld [vmem:[#allocation2 + $0x28] sm:$0x1]  ;;  %v416_v46 = vld [vmem:[#allocation2 + $0x27] sm:$0x1]  ;;  %v391_v47 = vld [vmem:[#allocation2 + $0x1c] sm:$0x1]  ;;  %v372_v48 = vpop.permute.xlu1 %371  ;;  %v370_v49 = vpop.permute.xlu0 %369  ;;  %v674_v11 = vmul.f32 %v1538_v10, %v1480_v43 }
  0xfb   : > { %477 = vrot.lane.b32.xlu1 %v452_v44, %s1210_s5  ;;  %404 = vst.msk [vmem:[#allocation2 + $0x2a] sm:$0x1] %vm394_vm5, %v400_v45  ;;  %420 = vst.msk [vmem:[#allocation2 + $0x2b] sm:$0x1] %vm394_vm5, %v416_v46  ;;  %v408_v50 = vld [vmem:[#allocation2 + $0x1b] sm:$0x1] }
  0xfc   : > { %396 = vst.msk [vmem:[#allocation2 + $0x18] sm:$0x1] %vm394_vm5, %v391_v47  ;;  %v1491_v51 = vld [vmem:[#allocation2 + $0x20] sm:$0xff]  ;;  %412 = vst.msk [vmem:[#allocation2 + $0x19] sm:$0x1] %vm394_vm5, %v408_v50 }
  0xfd   : > { %389 = vst.msk [vmem:[#allocation2 + $0x52] sm:$0xff] %vm381_vm4, %v372_v48  ;;  %388 = vst.msk [vmem:[#allocation2 + $0x4a] sm:$0xff] %vm381_vm4, %v370_v49  ;;  %v455_v52 = vmul.f32 %v1473_v36, %v1491_v51  ;;  %v529_v4 = vmul.f32 %v1505_v59, %v1491_v51  ;;  %v603_v9 = vmul.f32 %v1524_v5, %v1491_v51 }
  0xfe   : > { %v1558_v18 = vld [vmem:[#allocation2 + $0x10] sm:$0xf] }
  0xff   : > { %483 = vrot.lane.b32.xlu0 %v455_v52, %s1210_s5  ;;  %v1548_v14 = vld [vmem:[#allocation2] sm:$0xff]  ;;  %v453_v20 = vmul.f32 %v1473_v36, %v1558_v18  ;;  %v527_v31 = vmul.f32 %v1505_v59, %v1558_v18  ;;  %v601_v40 = vmul.f32 %v1524_v5, %v1558_v18  ;;  %v675_v49 = vmul.f32 %v1538_v10, %v1558_v18 }
 0x100   : > { %v401_v53 = vld [vmem:[#allocation2 + $0x40] sm:$0x1]  ;;  %v417_v54 = vld [vmem:[#allocation2 + $0x3f] sm:$0x1]  ;;  %v392_v55 = vld [vmem:[#allocation2 + $0x34] sm:$0x1]  ;;  %v451_v16 = vmul.f32 %v1473_v36, %v1548_v14  ;;  %v525_v29 = vmul.f32 %v1505_v59, %v1548_v14  ;;  %v599_v38 = vmul.f32 %v1524_v5, %v1548_v14  ;;  %v673_v47 = vmul.f32 %v1538_v10, %v1548_v14 }
 0x101   : > { %405 = vst.msk [vmem:[#allocation2 + $0x42] sm:$0x1] %vm394_vm5, %v401_v53  ;;  %421 = vst.msk [vmem:[#allocation2 + $0x43] sm:$0x1] %vm394_vm5, %v417_v54  ;;  %v409_v56 = vld [vmem:[#allocation2 + $0x33] sm:$0x1]  ;;  %v677_v52 = vmul.f32 %v1538_v10, %v1491_v51 }
 0x102   : > { %397 = vst.msk [vmem:[#allocation2 + $0x30] sm:$0x1] %vm394_vm5, %v392_v55  ;;  %v1500_v57 = vld [vmem:[#allocation2 + $0x38] sm:$0xff]  ;;  %413 = vst.msk [vmem:[#allocation2 + $0x31] sm:$0x1] %vm394_vm5, %v409_v56 }
 0x103   : > { %v458_v58 = vmul.f32 %v1473_v36, %v1500_v57  ;;  %v532_v3 = vmul.f32 %v1505_v59, %v1500_v57  ;;  %v606_v8 = vmul.f32 %v1524_v5, %v1500_v57  ;;  %v1546_v13 = vld [vmem:[#allocation2 + $0x18] sm:$0xff]  ;;  %v1556_v17 = vld [vmem:[#allocation2 + $0x28] sm:$0xf]  ;;  %v680_v53 = vmul.f32 %v1538_v10, %v1500_v57 }
 0x104   : > { %v402_v60 = vld [vmem:[#allocation2 + $0x58] sm:$0x1]  ;;  %v418_v61 = vld [vmem:[#allocation2 + $0x57] sm:$0x1]  ;;  %v393_v62 = vld [vmem:[#allocation2 + $0x4c] sm:$0x1]  ;;  %v454_v15 = vmul.f32 %v1473_v36, %v1546_v13  ;;  %v456_v19 = vmul.f32 %v1473_v36, %v1556_v17  ;;  %v528_v30 = vmul.f32 %v1505_v59, %v1546_v13  ;;  %v530_v32 = vmul.f32 %v1505_v59, %v1556_v17 }
 0x105   : > { %489 = vrot.lane.b32.xlu1 %v458_v58, %s1210_s5  ;;  %406 = vst.msk [vmem:[#allocation2 + $0x5a] sm:$0x1] %vm394_vm5, %v402_v60  ;;  %422 = vst.msk [vmem:[#allocation2 + $0x5b] sm:$0x1] %vm394_vm5, %v418_v61  ;;  %v410_v63 = vld [vmem:[#allocation2 + $0x4b] sm:$0x1]  ;;  %v602_v39 = vmul.f32 %v1524_v5, %v1546_v13  ;;  %v604_v41 = vmul.f32 %v1524_v5, %v1556_v17  ;;  %v676_v48 = vmul.f32 %v1538_v10, %v1546_v13 }
 0x106   : > { %398 = vst.msk [vmem:[#allocation2 + $0x48] sm:$0x1] %vm394_vm5, %v393_v62  ;;  %v1511_v0 = vld [vmem:[#allocation2 + $0x50] sm:$0xff]  ;;  %414 = vst.msk [vmem:[#allocation2 + $0x49] sm:$0x1] %vm394_vm5, %v410_v63  ;;  %v678_v50 = vmul.f32 %v1538_v10, %v1556_v17  ;;  %v1669_v61 = vstv %s423_s8 }
 0x107   : > { %v461_v2 = vmul.f32 %v1473_v36, %v1511_v0  ;;  %v535_v7 = vmul.f32 %v1505_v59, %v1511_v0  ;;  %v609_v12 = vmul.f32 %v1524_v5, %v1511_v0  ;;  %v683_v60 = vmul.f32 %v1538_v10, %v1511_v0 }
 0x108   : > { %v1576_v25 = vld [vmem:[#allocation2 + $0x40] sm:$0xf]  ;;  %v441_v62 = vmul.f32 %v1669_v61, %v1491_v51 }
 0x109   : > { %551 = vrot.lane.b32.xlu1 %v526_v1, %s1207_s20  ;;  %495 = vrot.lane.b32.xlu0 %v461_v2, %s1210_s5  ;;  %v1566_v21 = vld [vmem:[#allocation2 + $0x30] sm:$0xff]  ;;  %v459_v27 = vmul.f32 %v1473_v36, %v1576_v25  ;;  %v533_v35 = vmul.f32 %v1505_v59, %v1576_v25  ;;  %v607_v45 = vmul.f32 %v1524_v5, %v1576_v25 }
 0x10a   : > { %v457_v23 = vmul.f32 %v1473_v36, %v1566_v21  ;;  %v531_v33 = vmul.f32 %v1505_v59, %v1566_v21  ;;  %v605_v42 = vmul.f32 %v1524_v5, %v1566_v21  ;;  %v679_v54 = vmul.f32 %v1538_v10, %v1566_v21 }
 0x10b   : > { %v681_v56 = vmul.f32 %v1538_v10, %v1576_v25 }
 0x10c   : > { %v1578_v26 = vld [vmem:[#allocation2 + $0x58] sm:$0xf] }
 0x10d   : > { %563 = vrot.lane.b32.xlu1 %v532_v3, %s1207_s20  ;;  %557 = vrot.lane.b32.xlu0 %v529_v4, %s1207_s20  ;;  %v1568_v22 = vld [vmem:[#allocation2 + $0x48] sm:$0xff]  ;;  %v462_v28 = vmul.f32 %v1473_v36, %v1578_v26  ;;  %v536_v37 = vmul.f32 %v1505_v59, %v1578_v26  ;;  %v610_v46 = vmul.f32 %v1524_v5, %v1578_v26 }
 0x10e   : > { %v460_v24 = vmul.f32 %v1473_v36, %v1568_v22  ;;  %v534_v34 = vmul.f32 %v1505_v59, %v1568_v22  ;;  %v608_v44 = vmul.f32 %v1524_v5, %v1568_v22  ;;  %v682_v55 = vmul.f32 %v1538_v10, %v1568_v22 }
 0x10f   : > { %v684_v58 = vmul.f32 %v1538_v10, %v1578_v26  ;;  %v444_v3 = vmul.f32 %v1669_v61, %v1500_v57 }
 0x111   : > { %625 = vrot.lane.b32.xlu1 %v600_v6, %s1211_s24  ;;  %569 = vrot.lane.b32.xlu0 %v535_v7, %s1207_s20  ;;  %v447_v7 = vmul.f32 %v1669_v61, %v1511_v0 }
 0x115   : > { %637 = vrot.lane.b32.xlu1 %v606_v8, %s1211_s24  ;;  %631 = vrot.lane.b32.xlu0 %v603_v9, %s1211_s24 }
 0x119   : > { %699 = vrot.lane.b32.xlu1 %v674_v11, %s1212_s27  ;;  %643 = vrot.lane.b32.xlu0 %v609_v12, %s1211_s24 }
 0x11d   : > { %481 = vrot.lane.b32.xlu1 %v454_v15, %s1210_s5  ;;  %475 = vrot.lane.b32.xlu0 %v451_v16, %s1210_s5 }
 0x121   : > { %485 = vrot.lane.b32.xlu1 %v456_v19, %s1210_s5  ;;  %479 = vrot.lane.b32.xlu0 %v453_v20, %s1210_s5 }
 0x125   : > { %487 = vrot.lane.b32.xlu0 %v457_v23, %s1210_s5  ;;  %493 = vrot.lane.b32.xlu1 %v460_v24, %s1210_s5  ;;  %v438_v23 = vmul.f32 %v1669_v61, %v1480_v43 }
 0x129   : > { %491 = vrot.lane.b32.xlu0 %v459_v27, %s1210_s5  ;;  %497 = vrot.lane.b32.xlu1 %v462_v28, %s1210_s5 }
 0x12d   : > { %549 = vrot.lane.b32.xlu0 %v525_v29, %s1207_s20  ;;  %555 = vrot.lane.b32.xlu1 %v528_v30, %s1207_s20 }
 0x131   : > { %553 = vrot.lane.b32.xlu0 %v527_v31, %s1207_s20  ;;  %559 = vrot.lane.b32.xlu1 %v530_v32, %s1207_s20 }
 0x135   : > { %561 = vrot.lane.b32.xlu0 %v531_v33, %s1207_s20  ;;  %567 = vrot.lane.b32.xlu1 %v534_v34, %s1207_s20 }
 0x139   : > { %565 = vrot.lane.b32.xlu0 %v533_v35, %s1207_s20  ;;  %571 = vrot.lane.b32.xlu1 %v536_v37, %s1207_s20  ;;  %s1213_s20 = smov [#allocation9]  }
 0x13a   : > { %s1134_s19 = sshll.u32 %s1213_s20, 4  ;;  %s1135_s19 = int_to_ptr.vmem [resolvable:$false] %s1134_s19 }
 0x13b   : > { %s1136_s29 = scalar_lea.vmem %s1135_s19, 2048  ;;  %p1137_p6 = scmp.lt.s32.totalorder %s1797_s17, %s1135_s19 }
 0x13c   : > { %p1138_p4 = scmp.lt.s32.totalorder %s1136_s29, %s1130_s23 }
 0x13d   : > { %623 = vrot.lane.b32.xlu0 %v599_v38, %s1211_s24  ;;  %629 = vrot.lane.b32.xlu1 %v602_v39, %s1211_s24 }
 0x13e   : > { %p1139_p5 = por %p1138_p4, %p1137_p6 }
 0x140   : > { %p1140_p0 = pnand %p1139_p5, %p1133_p3 }
 0x141   : > { %627 = vrot.lane.b32.xlu0 %v601_v40, %s1211_s24  ;;  %633 = vrot.lane.b32.xlu1 %v604_v41, %s1211_s24 }
 0x145   : > { %635 = vrot.lane.b32.xlu0 %v605_v42, %s1211_s24  ;;  %641 = vrot.lane.b32.xlu1 %v608_v44, %s1211_s24 }
 0x149   : > { %639 = vrot.lane.b32.xlu0 %v607_v45, %s1211_s24  ;;  %645 = vrot.lane.b32.xlu1 %v610_v46, %s1211_s24 }
 0x14d   : > { %697 = vrot.lane.b32.xlu0 %v673_v47, %s1212_s27  ;;  %703 = vrot.lane.b32.xlu1 %v676_v48, %s1212_s27 }
 0x151   : > { %701 = vrot.lane.b32.xlu0 %v675_v49, %s1212_s27  ;;  %707 = vrot.lane.b32.xlu1 %v678_v50, %s1212_s27 }
 0x155   : > { %705 = vrot.lane.b32.xlu0 %v677_v52, %s1212_s27  ;;  %711 = vrot.lane.b32.xlu1 %v680_v53, %s1212_s27 }
 0x159   : > { %709 = vrot.lane.b32.xlu0 %v679_v54, %s1212_s27  ;;  %715 = vrot.lane.b32.xlu1 %v682_v55, %s1212_s27 }
 0x15d   : > { %713 = vrot.lane.b32.xlu0 %v681_v56, %s1212_s27  ;;  %719 = vrot.lane.b32.xlu1 %v684_v58, %s1212_s27 }
 0x161   : > { %717 = vrot.lane.b32.xlu0 %v683_v60, %s1212_s27  ;;  %v440_v60 = vmul.f32 %v1669_v61, %v1546_v13 }
 0x16d   : > { %v478_v63 = vpop.permute.xlu1 %477 }
 0x16e   : > { %v512_v24 = vadd.f32 %v478_v63, %v438_v23 }
 0x171   : > { %v484_v1 = vpop.permute.xlu0 %483 }
 0x172   : > { %v515_v2 = vadd.f32 %v484_v1, %v441_v62  ;;  %v437_v62 = vmul.f32 %v1669_v61, %v1548_v14 }
 0x177   : > { %v490_v4 = vpop.permute.xlu1 %489 }
 0x178   : > { %v518_v6 = vadd.f32 %v490_v4, %v444_v3  ;;  %v442_v4 = vmul.f32 %v1669_v61, %v1556_v17 }
 0x17b   : > { %v552_v8 = vpop.permute.xlu1 %551  ;;  %v496_v9 = vpop.permute.xlu0 %495 }
 0x17c   : > { %v521_v11 = vadd.f32 %v496_v9, %v447_v7  ;;  %v586_v0 = vadd.f32 %v552_v8, %v512_v24 }
 0x17f   : > { %v564_v12 = vpop.permute.xlu1 %563  ;;  %v558_v15 = vpop.permute.xlu0 %557 }
 0x180   : > { %v1677_v16 = vadd.f32 %v564_v12, %v518_v6  ;;  %v1679_v19 = vadd.f32 %v558_v15, %v515_v2  ;;  %v439_v6 = vmul.f32 %v1669_v61, %v1558_v18 }
 0x183   : > { %v626_v51 = vpop.permute.xlu1 %625  ;;  %v570_v20 = vpop.permute.xlu0 %569 }
 0x184   : > { %v595_v57 = vadd.f32 %v570_v20, %v521_v11  ;;  %v660_v29 = vadd.f32 %v626_v51, %v586_v0 }
 0x187   : > { %v1683_v27 = vpop.permute.xlu1 %637  ;;  %v1685_v28 = vpop.permute.xlu0 %631 }
 0x18b   : > { %v700_v30 = vpop.permute.xlu1 %699  ;;  %v644_v31 = vpop.permute.xlu0 %643 }
 0x18c   : > { %v734_v32 = vadd.f32 %v700_v30, %v660_v29  ;;  %v1687_v33 = vadd.f32 %v644_v31, %v595_v57  ;;  %v446_v29 = vmul.f32 %v1669_v61, %v1568_v22  ;;  %v443_v30 = vmul.f32 %v1669_v61, %v1566_v21 }
 0x18d   : > { %v448_v22 = vmul.f32 %v1669_v61, %v1578_v26  ;;  %v445_v21 = vmul.f32 %v1669_v61, %v1576_v25 }
 0x18e   : > { %747 = vst.msk [vmem:[#allocation3 + $0x8] sm:$0xff] %vm745_vm6, %v734_v32 }
 0x18f   : > { %v482_v34 = vpop.permute.xlu1 %481  ;;  %v476_v35 = vpop.permute.xlu0 %475 }
 0x190   : > { %v514_v63 = vadd.f32 %v482_v34, %v440_v60  ;;  %v511_v1 = vadd.f32 %v476_v35, %v437_v62  ;;  %v666_v34 = vadd.f32 %v1683_v27, %v1677_v16  ;;  %v663_v35 = vadd.f32 %v1685_v28, %v1679_v19 }
 0x193   : > { %v486_v37 = vpop.permute.xlu1 %485  ;;  %v480_v43 = vpop.permute.xlu0 %479 }
 0x194   : > { %v516_v9 = vadd.f32 %v486_v37, %v442_v4  ;;  %v513_v11 = vadd.f32 %v480_v43, %v439_v6 }
 0x197   : > { %v494_v38 = vpop.permute.xlu1 %493  ;;  %v488_v39 = vpop.permute.xlu0 %487 }
 0x198   : > { %v520_v37 = vadd.f32 %v494_v38, %v446_v29  ;;  %v517_v43 = vadd.f32 %v488_v39, %v443_v30  ;;  %v761_v39 = vld [vmem:[#allocation3 + $0x8] sm:$0xff] }
 0x199   : > { %v770_v4 = vmul.f32 %v761_v39, %v1669_v61 }
 0x19b   : > { %v498_v40 = vpop.permute.xlu1 %497  ;;  %v492_v41 = vpop.permute.xlu0 %491 }
 0x19c   : > { %v519_v19 = vadd.f32 %v492_v41, %v445_v21 }
 0x19f   : > { %v556_v42 = vpop.permute.xlu1 %555  ;;  %v550_v44 = vpop.permute.xlu0 %549 }
 0x1a0   : > { %v588_v7 = vadd.f32 %v556_v42, %v514_v63  ;;  %v585_v8 = vadd.f32 %v550_v44, %v511_v1 }
 0x1a3   : > { %v560_v45 = vpop.permute.xlu1 %559  ;;  %v554_v46 = vpop.permute.xlu0 %553 }
 0x1a4   : > { %v590_v51 = vadd.f32 %v560_v45, %v516_v9  ;;  %v587_v20 = vadd.f32 %v554_v46, %v513_v11 }
 0x1a7   : > { %v568_v47 = vpop.permute.xlu1 %567  ;;  %v562_v48 = vpop.permute.xlu0 %561 }
 0x1a8   : > { %v594_v45 = vadd.f32 %v568_v47, %v520_v37  ;;  %v591_v46 = vadd.f32 %v562_v48, %v517_v43 }
 0x1ab   : > { %v1690_v49 = vpop.permute.xlu1 %571  ;;  %v1692_v50 = vpop.permute.xlu0 %565 }
 0x1ac   : > { %v593_v47 = vadd.f32 %v1692_v50, %v519_v19 }
 0x1af   : > { %v630_v52 = vpop.permute.xlu1 %629  ;;  %v624_v53 = vpop.permute.xlu0 %623 }
 0x1b0   : > { %v662_v13 = vadd.f32 %v630_v52, %v588_v7  ;;  %v659_v12 = vadd.f32 %v624_v53, %v585_v8  ;;  %v522_v52 = vadd.f32 %v498_v40, %v448_v22 }
 0x1b2   : > { %v596_v25 = vadd.f32 %v1690_v49, %v522_v52 }
 0x1b3   : > { %v634_v54 = vpop.permute.xlu1 %633  ;;  %v628_v55 = vpop.permute.xlu0 %627 }
 0x1b4   : > { %v664_v24 = vadd.f32 %v634_v54, %v590_v51  ;;  %v661_v0 = vadd.f32 %v628_v55, %v587_v20 }
 0x1b7   : > { %v642_v56 = vpop.permute.xlu1 %641  ;;  %v636_v58 = vpop.permute.xlu0 %635 }
 0x1b8   : > { %v668_v53 = vadd.f32 %v642_v56, %v594_v45  ;;  %v665_v54 = vadd.f32 %v636_v58, %v591_v46 }
 0x1bb   : > { %v1698_v2 = vpop.permute.xlu1 %645  ;;  %v1700_v3 = vpop.permute.xlu0 %639 }
 0x1bc   : > { %v670_v6 = vadd.f32 %v1698_v2, %v596_v25  ;;  %v667_v9 = vadd.f32 %v1700_v3, %v593_v47 }
 0x1bf   : > { %v704_v15 = vpop.permute.xlu1 %703  ;;  %v698_v14 = vpop.permute.xlu0 %697 }
 0x1c0   : > { %v736_v23 = vadd.f32 %v704_v15, %v662_v13  ;;  %v733_v57 = vadd.f32 %v698_v14, %v659_v12 }
 0x1c2   : > { %750 = vst.msk [vmem:[#allocation3 + $0x18] sm:$0xff] %vm745_vm6, %v736_v23  ;;  %746 = vst.msk [vmem:[#allocation3] sm:$0xff] %vm745_vm6, %v733_v57 }
 0x1c3   : > { %v708_v17 = vpop.permute.xlu1 %707  ;;  %v702_v18 = vpop.permute.xlu0 %701 }
 0x1c4   : > { %v738_v31 = vadd.f32 %v708_v17, %v664_v24  ;;  %v735_v32 = vadd.f32 %v702_v18, %v661_v0 }
 0x1c6   : > { %752 = vst.msk [vmem:[#allocation3 + $0x28] sm:$0xf] %vm748_vm7, %v738_v31  ;;  %749 = vst.msk [vmem:[#allocation3 + $0x10] sm:$0xf] %vm748_vm7, %v735_v32 }
 0x1c7   : > { %v712_v42 = vpop.permute.xlu1 %711  ;;  %v706_v44 = vpop.permute.xlu0 %705 }
 0x1c8   : > { %v740_v16 = vadd.f32 %v712_v42, %v666_v34  ;;  %v737_v27 = vadd.f32 %v706_v44, %v663_v35 }
 0x1c9   : > { %v760_v28 = vld [vmem:[#allocation3] sm:$0xff]  ;;  %v762_v51 = vld [vmem:[#allocation3 + $0x18] sm:$0xff] }
 0x1ca   : > { %v778_v38 = vld [vmem:[#allocation3 + $0x1] sm:$0xff]  ;;  %v769_v55 = vmul.f32 %v760_v28, %v1669_v61  ;;  %754 = vst.msk [vmem:[#allocation3 + $0x38] sm:$0xff] %vm745_vm6, %v740_v16  ;;  %751 = vst.msk [vmem:[#allocation3 + $0x20] sm:$0xff] %vm745_vm6, %v737_v27  ;;  %v771_v37 = vmul.f32 %v762_v51, %v1669_v61 }
 0x1cb   : > { %v787_v26 = vmul.f32 %v778_v38, %v1473_v36  ;;  %v804_v60 = vld [vmem:[#allocation3 + $0x2] sm:$0xff]  ;;  %v716_v41 = vpop.permute.xlu1 %715  ;;  %v710_v48 = vpop.permute.xlu0 %709 }
 0x1cc   : > { %v830_v40 = vld [vmem:[#allocation3 + $0x3] sm:$0xff]  ;;  %v813_v56 = vmul.f32 %v804_v60, %v1505_v59  ;;  %v742_v63 = vadd.f32 %v716_v41, %v668_v53  ;;  %v739_v1 = vadd.f32 %v710_v48, %v665_v54 }
 0x1cd   : > { %v795_v62 = vadd.f32 %v787_v26, %v769_v55  ;;  %v856_v58 = vld [vmem:[#allocation3 + $0x4] sm:$0xff]  ;;  %v839_v50 = vmul.f32 %v830_v40, %v1524_v5  ;;  %v857_v24 = vld [vmem:[#allocation3 + $0xc] sm:$0xff] }
 0x1ce   : > { %v779_v7 = vld [vmem:[#allocation3 + $0x9] sm:$0xff]  ;;  %756 = vst.msk [vmem:[#allocation3 + $0x48] sm:$0xff] %vm745_vm6, %v742_v63  ;;  %753 = vst.msk [vmem:[#allocation3 + $0x30] sm:$0xff] %vm745_vm6, %v739_v1  ;;  %v865_v13 = vmul.f32 %v856_v58, %v1538_v10  ;;  %v866_v44 = vmul.f32 %v857_v24, %v1538_v10 }
 0x1cf   : > { %v805_v8 = vld [vmem:[#allocation3 + $0xa] sm:$0xff]  ;;  %v821_v49 = vadd.f32 %v813_v56, %v795_v62  ;;  %v788_v11 = vmul.f32 %v779_v7, %v1473_v36  ;;  %v720_v14 = vpop.permute.xlu1 %719  ;;  %v714_v2 = vpop.permute.xlu0 %713 }
 0x1d0   : > { %v814_v12 = vmul.f32 %v805_v8, %v1505_v59  ;;  %v831_v15 = vld [vmem:[#allocation3 + $0xb] sm:$0xff]  ;;  %v744_v3 = vadd.f32 %v720_v14, %v670_v6  ;;  %v741_v57 = vadd.f32 %v714_v2, %v667_v9 }
 0x1d1   : > { %v847_v20 = vadd.f32 %v839_v50, %v821_v49  ;;  %v796_v23 = vadd.f32 %v788_v11, %v770_v4  ;;  %v763_v0 = vld [vmem:[#allocation3 + $0x20] sm:$0xff]  ;;  %v840_v30 = vmul.f32 %v831_v15, %v1524_v5  ;;  %v765_v47 = vld [vmem:[#allocation3 + $0x38] sm:$0xff] }
 0x1d2   : > { %v780_v17 = vld [vmem:[#allocation3 + $0x19] sm:$0xff]  ;;  %v772_v31 = vmul.f32 %v763_v0, %v1669_v61  ;;  %v781_v32 = vld [vmem:[#allocation3 + $0x21] sm:$0xff]  ;;  %758 = vst.msk [vmem:[#allocation3 + $0x58] sm:$0xf] %vm748_vm7, %v744_v3  ;;  %755 = vst.msk [vmem:[#allocation3 + $0x40] sm:$0xf] %vm748_vm7, %v741_v57  ;;  %v774_v49 = vmul.f32 %v765_v47, %v1669_v61 }
 0x1d3   : > { %v873_v18 = vadd.f32 %v865_v13, %v847_v20  ;;  %v822_v29 = vadd.f32 %v814_v12, %v796_v23  ;;  %v806_v34 = vld [vmem:[#allocation3 + $0x1a] sm:$0xff]  ;;  %v807_v35 = vld [vmem:[#allocation3 + $0x22] sm:$0xff]  ;;  %v789_v43 = vmul.f32 %v780_v17, %v1473_v36  ;;  %v790_v22 = vmul.f32 %v781_v32, %v1473_v36  ;;  %v718_v21 = vpop.permute.xlu0 %717 }
 0x1d4   : > { %v815_v45 = vmul.f32 %v806_v34, %v1505_v59  ;;  %v832_v46 = vld [vmem:[#allocation3 + $0x1b] sm:$0xff]  ;;  %v833_v16 = vld [vmem:[#allocation3 + $0x23] sm:$0xff]  ;;  %v816_v19 = vmul.f32 %v807_v35, %v1505_v59  ;;  %v743_v39 = vadd.f32 %v718_v21, %v1687_v33 }
 0x1d5   : > { %v848_v42 = vadd.f32 %v840_v30, %v822_v29  ;;  %881 = vst.msk [vmem:[%s1749_s14] sm:$0xff] %vm745_vm6, %v873_v18  ;;  %v797_v27 = vadd.f32 %v789_v43, %v771_v37  ;;  %v798_v52 = vadd.f32 %v790_v22, %v772_v31  ;;  %v764_v28 = vld [vmem:[#allocation3 + $0x30] sm:$0xff]  ;;  %v858_v54 = vld [vmem:[#allocation3 + $0x1c] sm:$0xff]  ;;  %v859_v55 = vld [vmem:[#allocation3 + $0x24] sm:$0xff]  ;;  %v841_v48 = vmul.f32 %v832_v46, %v1524_v5 }
 0x1d6   : > { %v782_v38 = vld [vmem:[#allocation3 + $0x31] sm:$0xff]  ;;  %v773_v26 = vmul.f32 %v764_v28, %v1669_v61  ;;  %v842_v62 = vmul.f32 %v833_v16, %v1524_v5  ;;  %757 = vst.msk [vmem:[#allocation3 + $0x50] sm:$0xff] %vm745_vm6, %v743_v39  ;;  %v867_v4 = vmul.f32 %v858_v54, %v1538_v10  ;;  %v868_v6 = vmul.f32 %v859_v55, %v1538_v10  ;;  %v766_v2 = vld [vmem:[#allocation3 + $0x48] sm:$0xff] }
 0x1d7   : > { %v874_v53 = vadd.f32 %v866_v44, %v848_v42  ;;  %v791_v60 = vmul.f32 %v782_v38, %v1473_v36  ;;  %v808_v25 = vld [vmem:[#allocation3 + $0x32] sm:$0xff]  ;;  %v823_v40 = vadd.f32 %v815_v45, %v797_v27  ;;  %v824_v41 = vadd.f32 %v816_v19, %v798_v52 }
 0x1d8   : > { %v834_v56 = vld [vmem:[#allocation3 + $0x33] sm:$0xff]  ;;  %v817_v58 = vmul.f32 %v808_v25, %v1505_v59  ;;  %v775_v31 = vmul.f32 %v766_v2, %v1669_v61 }
 0x1d9   : > { %v799_v33 = vadd.f32 %v791_v60, %v773_v26  ;;  %882 = vst.msk [vmem:[%s1749_s14 + $0x8] sm:$0xff] %vm745_vm6, %v874_v53  ;;  %v849_v63 = vadd.f32 %v841_v48, %v823_v40  ;;  %v850_v1 = vadd.f32 %v842_v62, %v824_v41  ;;  %v860_v7 = vld [vmem:[#allocation3 + $0x34] sm:$0xff]  ;;  %v843_v11 = vmul.f32 %v834_v56, %v1524_v5  ;;  %v861_v57 = vld [vmem:[#allocation3 + $0x3c] sm:$0xff] }
 0x1da   : > { %v783_v8 = vld [vmem:[#allocation3 + $0x39] sm:$0xff]  ;;  %v869_v20 = vmul.f32 %v860_v7, %v1538_v10  ;;  %v870_v21 = vmul.f32 %v861_v57, %v1538_v10 }
 0x1db   : > { %v809_v9 = vld [vmem:[#allocation3 + $0x3a] sm:$0xff]  ;;  %v825_v50 = vadd.f32 %v817_v58, %v799_v33  ;;  %v792_v13 = vmul.f32 %v783_v8, %v1473_v36  ;;  %v875_v12 = vadd.f32 %v867_v4, %v849_v63  ;;  %v876_v15 = vadd.f32 %v868_v6, %v850_v1 }
 0x1dc   : > { %v835_v14 = vld [vmem:[#allocation3 + $0x3b] sm:$0xff]  ;;  %v818_v3 = vmul.f32 %v809_v9, %v1505_v59 }
 0x1dd   : > { %v851_v51 = vadd.f32 %v843_v11, %v825_v50  ;;  %v800_v23 = vadd.f32 %v792_v13, %v774_v49  ;;  %883 = vst.msk [vmem:[%s1749_s14 + $0x10] sm:$0xff] %vm745_vm6, %v875_v12  ;;  %884 = vst.msk [vmem:[%s1749_s14 + $0x18] sm:$0xff] %vm745_vm6, %v876_v15  ;;  %v844_v17 = vmul.f32 %v835_v14, %v1524_v5  ;;  %v767_v18 = vld [vmem:[#allocation3 + $0x50] sm:$0xff] }
 0x1de   : > { %v784_v29 = vld [vmem:[#allocation3 + $0x49] sm:$0xff]  ;;  %v785_v30 = vld [vmem:[#allocation3 + $0x51] sm:$0xff]  ;;  %v776_v32 = vmul.f32 %v767_v18, %v1669_v61 }
 0x1df   : > { %v877_v24 = vadd.f32 %v869_v20, %v851_v51  ;;  %v826_v0 = vadd.f32 %v818_v3, %v800_v23  ;;  %v793_v34 = vmul.f32 %v784_v29, %v1473_v36  ;;  %v794_v35 = vmul.f32 %v785_v30, %v1473_v36  ;;  %v810_v37 = vld [vmem:[#allocation3 + $0x4a] sm:$0xff]  ;;  %v811_v43 = vld [vmem:[#allocation3 + $0x52] sm:$0xff] }
 0x1e0   : > { %v836_v42 = vld [vmem:[#allocation3 + $0x4b] sm:$0xff]  ;;  %v837_v44 = vld [vmem:[#allocation3 + $0x53] sm:$0xff]  ;;  %v819_v61 = vmul.f32 %v810_v37, %v1505_v59  ;;  %v820_v16 = vmul.f32 %v811_v43, %v1505_v59 }
 0x1e1   : > { %v852_v22 = vadd.f32 %v844_v17, %v826_v0  ;;  %885 = vst.msk [vmem:[%s1749_s14 + $0x20] sm:$0xff] %vm745_vm6, %v877_v24  ;;  %v801_v45 = vadd.f32 %v793_v34, %v775_v31  ;;  %v802_v46 = vadd.f32 %v794_v35, %v776_v32  ;;  %v862_v36 = vld [vmem:[#allocation3 + $0x4c] sm:$0xff]  ;;  %v863_v52 = vld [vmem:[#allocation3 + $0x54] sm:$0xff]  ;;  %v845_v38 = vmul.f32 %v836_v42, %v1524_v5 }
 0x1e2   : > { %v846_v39 = vmul.f32 %v837_v44, %v1524_v5  ;;  %v871_v59 = vmul.f32 %v862_v36, %v1538_v10  ;;  %v872_v55 = vmul.f32 %v863_v52, %v1538_v10 }
 0x1e3   : > { %v878_v27 = vadd.f32 %v870_v21, %v852_v22  ;;  %v827_v19 = vadd.f32 %v819_v61, %v801_v45  ;;  %v828_v28 = vadd.f32 %v820_v16, %v802_v46 }
 0x1e5   : > { %886 = vst.msk [vmem:[%s1749_s14 + $0x28] sm:$0xff] %vm745_vm6, %v878_v27  ;;  %v853_v53 = vadd.f32 %v845_v38, %v827_v19  ;;  %v854_v54 = vadd.f32 %v846_v39, %v828_v28 }
 0x1e7   : > { %v879_v5 = vadd.f32 %v871_v59, %v853_v53  ;;  %v880_v26 = vadd.f32 %v872_v55, %v854_v54 }
 0x1e9   : > { %887 = vst.msk [vmem:[%s1749_s14 + $0x30] sm:$0xff] %vm745_vm6, %v879_v5  ;;  %888 = vst.msk [vmem:[%s1749_s14 + $0x38] sm:$0xff] %vm745_vm6, %v880_v26 }
 0x1ea   : > { %1143 = shalt.err (!%p1140_p0)
}
 0x1eb   : > { %s1144_s30 = scalar_lea.hbm %s1795_s26, 1024  ;;  %s1148_s6 = scalar_lea.hbm %s1847_s2, 2048 }
 0x1ec   : > { %p1145_p8 = scmp.ne.s32.totalorder %s1795_s26, %s1144_s30  ;;  %p1149_p1 = scmp.lt.u32.totalorder %s1795_s26, %s1847_s2 }
 0x1ed   : > { %p1150_p2 = scmp.lt.u32.totalorder %s1148_s6, %s1144_s30  ;;  %p1152_p12 = scmp.lt.u32.totalorder %s1144_s30, %s1795_s26 }
 0x1ee   : > { %p1146_p9 = pnand %p1145_p8, %p1861_p13 }
 0x1ef   : > { %p1151_p11 = por %p1150_p2, %p1149_p1 }
 0x1f0   : > { %p1147_p10 = pneg %p1146_p9 }
 0x1f1   : > { %p1153_p7 = por %p1152_p12, %p1151_p11 }
 0x1f3   : > { %p1154_p3 = pnand %p1153_p7, %p1147_p10 }
 0x1f5   : > { %1157 = shalt.err (!%p1154_p3)
}
 0x1f6   : > { %s1214_s27 = smov 128   ;;  %s1215_s8 = smov 8  }
 0x1f7   : > { %1025 = dma.vmem_to_hbm [thread:$0]  (%p1861_p13), %s1797_s17, 1024, %s1795_s26, %s890_s13, %s1214_s27, %s1214_s27, %s1215_s8  }
 0x1f8 PF: > { %s919_s14 = sand.u32 1, %s1188_s9   ;;  %p1862_p6 = scmp.ne.s32.totalorder %s1854_s22, 0 }
 0x1f9   : > { %p1863_p4 = scmp.ge.s32.totalorder %s1200_s12, 2  ;;  %s920_s16 = scalar_lea.sflag [#allocation6], %s919_s14 }
 0x1fb   : > { %p1036_p5 = pnand %p1863_p4, %p1862_p6 }
 0x1fd   : > { %1183 = dma.done.wait (!%p1036_p5), %s920_s16, 1024  }
 0x1fe   : > { %1185 = vsyncadd (!%p1036_p5), %s920_s16, 4294966272  ;;  %p16_p0 = scmp.ge.s32.totalorder %s1256_s15, 4   ;;  %s1864_s9 = smov %s1192_s10 }
 0x1ff   : > { %s1865_s10 = smov %s1196_s11  ;;  %s1866_s11 = smov %s1268_s18 }
 0x200   : > { %s1867_s12 = smov %s1256_s15  ;;  %18 = sbr.rel (!%p16_p0) target bundleno = 6 (0x6), region = 78 }
 0x207   :  { %925 = vsyncpa [#allocation5], 1 }
 0x208   :  { %927 = vsyncpa [#allocation5 + $0x1], 1 }
 0x209   :  { %928 = vsyncpa [#allocation6], 1 }
 0x20a   :  { %930 = vsyncpa [#allocation6 + $0x1], 1 }
 0x20b   :  { %931 = vsyncpa [#allocation7], 1 }
 0x20c   :  { %933 = vsyncpa [#allocation7 + $0x1], 1 }

</bundles_post_ra>
